<compile_context>
chip_gen: v5e
topology: v5e:2x2
jax: 0.10.0
libtpu: 0.0.40
codegen_flags: <defaults>
</compile_context>

<pallas_src>
import jax
import jax.numpy as jnp
from jax import lax
from jax.experimental import pallas as pl
from jax.experimental.pallas import tpu as pltpu


_LANE = 128             # vreg lane width
_STRIP = 4096           # lanes per inner strip (4 f32 vregs per row)
_TILE_CAP = 64 * 1024   # max lanes per grid step: (4, 64K) f32 block = 1 MiB


def _linear_kernel(x_ref, w_ref, b_ref, o_ref):
    # x_ref: (K, tile) f32 VMEM  (features on sublanes, batch lane-dense)
    # w_ref: (N*K,) f32 SMEM     (row-major nn.Linear weight)
    # b_ref: (N,)   f32 SMEM
    # o_ref: (N, tile) f32 VMEM  (lane-dense output)
    K, tile = x_ref.shape
    N = o_ref.shape[0]

    # Hoist all SMEM scalar reads once per invocation.
    w = [[w_ref[n * K + k] for k in range(K)] for n in range(N)]
    b = [b_ref[n] for n in range(N)]

    # Strip-mine the lane axis so per-strip live values are a few vregs
    # (no VMEM spills at 1 MiB blocks).  `tile` is static; the wrapper
    # guarantees tile % strip == 0.
    strip = min(_STRIP, tile)
    n_strips = tile // strip

    def strip_body(s, carry):
        off = pl.multiple_of(s * strip, strip)
        for n in range(N):                        # N, K tiny & static -> unrolled VPU FMAs
            acc = x_ref[0:1, pl.ds(off, strip)] * w[n][0] + b[n]
            for k in range(1, K):
                acc = acc + x_ref[k:k + 1, pl.ds(off, strip)] * w[n][k]
            o_ref[n:n + 1, pl.ds(off, strip)] = acc.astype(o_ref.dtype)
        return carry

    lax.fori_loop(0, n_strips, strip_body, None, unroll=True)


def _choose_tile(batch, *, cap=_TILE_CAP, min_steps=2):
    """Lanes per grid step: large enough to amortize per-step overhead
    (~1 MiB input blocks), small enough to double-buffer inside v5e's 16 MiB
    scoped VMEM, and >= `min_steps` grid steps when B allows it so v7x's two
    TensorCores both stream."""
    t = pl.cdiv(batch, min_steps)
    t = pl.cdiv(t, _LANE) * _LANE            # lane-aligned
    t = max(_LANE, min(t, cap))
    if t > _STRIP:                            # keep tile a multiple of the inner strip
        t = pl.cdiv(t, _STRIP) * _STRIP
    return t


def linear_features_major(x_kb, weight, bias):
    """Core kernel. x_kb: (K, B) features-major (batch lane-dense) -> (N, B)."""
    K, B = x_kb.shape
    N, K2 = weight.shape
    assert K == K2 and bias.shape == (N,)

    tile = _choose_tile(B)
    grid = (pl.cdiv(B, tile),)    # ragged last block is fine: per-lane elementwise only

    w_flat = weight.reshape(-1)   # (N*K,) row-major -> SMEM scalars
    b_flat = bias.reshape(-1)     # (N,)             -> SMEM scalars

    return pl.pallas_call(
        _linear_kernel,
        out_shape=jax.ShapeDtypeStruct((N, B), x_kb.dtype),
        grid=grid,
        in_specs=[
            pl.BlockSpec((K, tile), lambda i: (0, i)),
            pl.BlockSpec(memory_space=pltpu.MemorySpace.SMEM),
            pl.BlockSpec(memory_space=pltpu.MemorySpace.SMEM),
        ],
        out_specs=pl.BlockSpec((N, tile), lambda i: (0, i)),
        compiler_params=pltpu.CompilerParams(
            dimension_semantics=("parallel",)),
    )(x_kb, w_flat, b_flat)


def linear_pallas(x, weight, bias):
    """nn.Linear semantics: x (B, K) -> (B, N).

    The x.T below is an extra HBM relayout; prefer producing (K, B) upstream
    and calling `linear_features_major` directly, or fusing this linear.
    """
    y_kb = linear_features_major(x.T, weight, bias)
    return y_kb.T                 # (N, B) -> (B, N); for N=1 this is ~a reshape


if __name__ == "__main__":
    key = jax.random.PRNGKey(0)
    kx, kw, kb, kx2, kx3 = jax.random.split(key, 5)

    B, IN_F, OUT_F = 8, 4, 1
    x = jax.random.normal(kx, (B, IN_F), dtype=jnp.float32)

    # Deterministic parameter init mimicking nn.Linear default (uniform +-1/sqrt(in)).
    bound = 1.0 / jnp.sqrt(jnp.float32(IN_F))
    weight = jax.random.uniform(kw, (OUT_F, IN_F), jnp.float32, -bound, bound)
    bias = jax.random.uniform(kb, (OUT_F,), jnp.float32, -bound, bound)

    out = linear_pallas(x, weight, bias)
    jax.block_until_ready(out)
    ref = x @ weight.T + bias
    assert out.shape == (B, OUT_F)
    assert jnp.allclose(out, ref, atol=1e-5, rtol=1e-5), (out, ref)

    # Larger batch: exercises multi-step "parallel" grid + ragged last block.
    B2 = 1000
    x2 = jax.random.normal(kx2, (B2, IN_F), dtype=jnp.float32)
    out2 = linear_pallas(x2, weight, bias)
    jax.block_until_ready(out2)
    ref2 = x2 @ weight.T + bias
    assert out2.shape == (B2, OUT_F)
    assert jnp.allclose(out2, ref2, atol=1e-5, rtol=1e-5)

    # Larger still: exercises multi-strip inner loop + ragged last block.
    B3 = 70_000
    x3 = jax.random.normal(kx3, (B3, IN_F), dtype=jnp.float32)
    out3 = linear_pallas(x3, weight, bias)
    jax.block_until_ready(out3)
    ref3 = x3 @ weight.T + bias
    assert out3.shape == (B3, OUT_F)
    assert jnp.allclose(out3, ref3, atol=1e-5, rtol=1e-5)

    print("KERNEL_OK")
</pallas_src>

<mosaic_0001>
module attributes {stable_mosaic.version = 11 : i64} {
  func.func @_linear_kernel(%arg0: i32, %arg1: memref<4x128xf32, #tpu.memory_space<vmem>>, %arg2: memref<4xf32, #tpu.memory_space<smem>>, %arg3: memref<1xf32, #tpu.memory_space<smem>>, %arg4: memref<1x128xf32, #tpu.memory_space<vmem>>) attributes {dimension_semantics = [#tpu.dimension_semantics<parallel>], iteration_bounds = array<i64: 1>, scalar_prefetch = 0 : i64, scratch_operands = 0 : i64, tpu.core_type = #tpu.core_type<tc>, window_params = [{transform_indices = @transform_0, window_bounds = array<i64: 4, 128>}, {transform_indices = @transform_1, window_bounds = array<i64: 4>}, {transform_indices = @transform_2, window_bounds = array<i64: 1>}, {transform_indices = @transform_3, window_bounds = array<i64: 1, 128>}]} {
    %c0 = arith.constant 0 : index
    %0 = memref.load %arg2[%c0] : memref<4xf32, #tpu.memory_space<smem>>
    %c1 = arith.constant 1 : index
    %1 = memref.load %arg2[%c1] : memref<4xf32, #tpu.memory_space<smem>>
    %c2 = arith.constant 2 : index
    %2 = memref.load %arg2[%c2] : memref<4xf32, #tpu.memory_space<smem>>
    %c3 = arith.constant 3 : index
    %3 = memref.load %arg2[%c3] : memref<4xf32, #tpu.memory_space<smem>>
    %c0_0 = arith.constant 0 : index
    %4 = memref.load %arg3[%c0_0] : memref<1xf32, #tpu.memory_space<smem>>
    %c0_i32 = arith.constant 0 : i32
    %c128_i32 = arith.constant 128 : i32
    %5 = arith.muli %c0_i32, %c128_i32 : i32
    %6 = tpu.assume_multiple %5, 128 : i32
    %c0_1 = arith.constant 0 : index
    %7 = arith.index_cast %6 : i32 to index
    %8 = vector.load %arg1[%c0_1, %7] : memref<4x128xf32, #tpu.memory_space<vmem>>, vector<1x128xf32>
    %9 = vector.broadcast %0 : f32 to vector<1x128xf32>
    %10 = arith.mulf %8, %9 : vector<1x128xf32>
    %11 = vector.broadcast %4 : f32 to vector<1x128xf32>
    %12 = arith.addf %10, %11 : vector<1x128xf32>
    %c1_2 = arith.constant 1 : index
    %13 = arith.index_cast %6 : i32 to index
    %14 = vector.load %arg1[%c1_2, %13] : memref<4x128xf32, #tpu.memory_space<vmem>>, vector<1x128xf32>
    %15 = vector.broadcast %1 : f32 to vector<1x128xf32>
    %16 = arith.mulf %14, %15 : vector<1x128xf32>
    %17 = arith.addf %12, %16 : vector<1x128xf32>
    %c2_3 = arith.constant 2 : index
    %18 = arith.index_cast %6 : i32 to index
    %19 = vector.load %arg1[%c2_3, %18] : memref<4x128xf32, #tpu.memory_space<vmem>>, vector<1x128xf32>
    %20 = vector.broadcast %2 : f32 to vector<1x128xf32>
    %21 = arith.mulf %19, %20 : vector<1x128xf32>
    %22 = arith.addf %17, %21 : vector<1x128xf32>
    %c3_4 = arith.constant 3 : index
    %23 = arith.index_cast %6 : i32 to index
    %24 = vector.load %arg1[%c3_4, %23] : memref<4x128xf32, #tpu.memory_space<vmem>>, vector<1x128xf32>
    %25 = vector.broadcast %3 : f32 to vector<1x128xf32>
    %26 = arith.mulf %24, %25 : vector<1x128xf32>
    %27 = arith.addf %22, %26 : vector<1x128xf32>
    %c0_5 = arith.constant 0 : index
    %28 = arith.index_cast %6 : i32 to index
    %29 = vector.load %arg4[%c0_5, %28] : memref<1x128xf32, #tpu.memory_space<vmem>>, vector<1x128xf32>
    tpu.vector_store %arg4[%c0_5, %28], %27 {strides = array<i32>} : memref<1x128xf32, #tpu.memory_space<vmem>>, vector<1x128xf32>,
    %c1_i32 = arith.constant 1 : i32
    return
  }
  func.func @transform_0(%arg0: i32) -> (i32, i32) {
    %c0_i32 = arith.constant 0 : i32
    %c0_i32_0 = arith.constant 0 : i32
    return %c0_i32, %arg0 : i32, i32
  }
  func.func @transform_1(%arg0: i32) -> i32 {
    %c0_i32 = arith.constant 0 : i32
    %c0_i32_0 = arith.constant 0 : i32
    return %c0_i32 : i32
  }
  func.func @transform_2(%arg0: i32) -> i32 {
    %c0_i32 = arith.constant 0 : i32
    %c0_i32_0 = arith.constant 0 : i32
    return %c0_i32 : i32
  }
  func.func @transform_3(%arg0: i32) -> (i32, i32) {
    %c0_i32 = arith.constant 0 : i32
    %c0_i32_0 = arith.constant 0 : i32
    return %c0_i32, %arg0 : i32, i32
  }
}

</mosaic_0001>

<bundles_post_ra>
// kernel: tpu_custom_call.1
= control target key start
LH: loop header
LB: loop body
LE: loop exit
PB: predicated region body
PF: predicated region fallthrough
CT: control target
= control target key end

     0   :  { %9 = vsyncpa [#allocation4], 0  ;;  %s191_s0 = inlined_call_operand.hbm [shape: f32[4,8], index: 0, kind: input, shape index: {}]   ;;  %s192_s1 = inlined_call_operand.vmem [shape: f32[4], index: 1, kind: input, shape index: {}]   ;;  %s193_s2 = inlined_call_operand.<no memory space> [shape: f32[1], index: 2, kind: input, shape index: {}]   ;;  %s194_s3 = inlined_call_operand.hbm [shape: f32[1,8], index: 3, kind: output, shape index: {}]  }
   0x1   :  { %10 = vsyncpa [#allocation6], 0 }
   0x2   :  { %11 = vsyncpa [#allocation5], 0  ;;  %s17_s14 = sshll.u32 %s191_s0, 4  ;;  %s156_s15 = smov [#allocation3]   ;;  %s18_s14 = int_to_ptr.hbm [resolvable:$true] %s17_s14 }
   0x3   :  { %s19_s16 = sshll.u32 %s156_s15, 4  ;;  %s28_s19 = sshll.u32 %s192_s1, 4  ;;  %s20_s16 = int_to_ptr.vmem [resolvable:$true] %s19_s16  ;;  %s29_s19 = int_to_ptr.vmem [resolvable:$true] %s28_s19 }
   0x4   :  { %22 = dma.hbm_to_vmem [thread:$0]  %s18_s14, 64, %s20_s16, [#allocation4]  }
   0x5   :  { %s157_s20 = smov [#allocation7]  }
   0x6   :  { %31 = dma.vmem_to_smem %s29_s19, 16, %s157_s20, [#allocation6]  }
   0x7   :  { %150 = dma.done.wait [#allocation4], 64  }
   0x8   :  { %151 = vsyncadd [#allocation4], 4294967232 }
   0x9   :  { %152 = dma.done.wait [#allocation6], 16  }
   0xa   :  { %153 = vsyncadd [#allocation6], 4294967280 }
   0xb   :  { %42 = sfence }
   0xc   :  { %s43_s21 = sld [smem:[#allocation7]]  ;;  %v48_v0 = vld [vmem:[#allocation3] sm:$0x1]  ;;  %v53_v1 = vld [vmem:[#allocation3 + $0x1] sm:$0x1]  ;;  %v51_v3 = vstv %s193_s2  ;;  %s158_s1 = smov [#allocation8]  }
   0xd   :  { %s84_s22 = sld [smem:[#allocation7 + $0x1]]  ;;  %v57_v4 = vld [vmem:[#allocation3 + $0x2] sm:$0x1]  ;;  %v61_v9 = vld [vmem:[#allocation3 + $0x3] sm:$0x1]  ;;  %s71_s26 = sshll.u32 %s158_s1, 4  ;;  %s72_s26 = int_to_ptr.vmem [resolvable:$true] %s71_s26 }
   0xe   :  { %s85_s0 = sld [smem:[#allocation7 + $0x2]]  ;;  %s73_s29 = sshll.u32 %s194_s3, 4  ;;  %s74_s29 = int_to_ptr.hbm [resolvable:$true] %s73_s29 }
   0xf   :  { %s86_s23 = sld [smem:[#allocation7 + $0x3]] }
  0x12   :  { %v49_v2 = vstv %s43_s21 }
  0x13   :  { %v50_v5 = vmul.f32 %v49_v2, %v48_v0  ;;  %v54_v6 = vstv %s84_s22 }
  0x14   :  { %v55_v7 = vmul.f32 %v54_v6, %v53_v1  ;;  %v58_v8 = vstv %s85_s0 }
  0x15   :  { %v52_v10 = vadd.f32 %v51_v3, %v50_v5  ;;  %v59_v11 = vmul.f32 %v58_v8, %v57_v4  ;;  %v62_v12 = vstv %s86_s23 }
  0x16   :  { %v63_v14 = vmul.f32 %v62_v12, %v61_v9 }
  0x17   :  { %v56_v13 = vadd.f32 %v55_v7, %v52_v10 }
  0x19   :  { %v60_v15 = vadd.f32 %v59_v11, %v56_v13 }
  0x1b   :  { %v64_v16 = vadd.f32 %v63_v14, %v60_v15 }
  0x1d   :  { %65 = vst [vmem:[#allocation8] sm:$0x1] %v64_v16 }
  0x1e   :  { %76 = dma.vmem_to_hbm [thread:$0]  %s72_s26, 16, %s74_s29, [#allocation5]  }
  0x1f   :  { %154 = dma.done.wait [#allocation5], 16  }
  0x20   :  { %155 = vsyncadd [#allocation5], 4294967280 }
  0x21   :  { %81 = vsyncpa [#allocation4], 1 }
  0x22   :  { %82 = vsyncpa [#allocation5], 1 }
  0x23   :  { %83 = vsyncpa [#allocation6], 1 }

</bundles_post_ra>
